<compile_context>
chip_gen: v5e
topology: v5e:2x2
jax: 0.10.0
libtpu: 0.0.40
codegen_flags: <defaults>
</compile_context>

<pallas_src>
import math
import numpy as np
import jax
import jax.numpy as jnp
from jax.experimental import pallas as pl
from jax.experimental.pallas import tpu as pltpu


# --------------------- filter rotation (parameter preprocessing) --------------------

def _trilinear_grid_sample(vol, ix, iy, iz):
    """vol: (C, D, H, W); ix/iy/iz: (D, H, W) unnormalized sample coordinates.
    zeros padding, matches torch.grid_sample(mode='bilinear', align_corners=False)."""
    C, D, H, W = vol.shape
    x0 = jnp.floor(ix); y0 = jnp.floor(iy); z0 = jnp.floor(iz)
    fx = ix - x0; fy = iy - y0; fz = iz - z0

    def gather(zc, yc, xc):
        zi = zc.astype(jnp.int32); yi = yc.astype(jnp.int32); xi = xc.astype(jnp.int32)
        valid = ((zi >= 0) & (zi < D) & (yi >= 0) & (yi < H) & (xi >= 0) & (xi < W))
        zcl = jnp.clip(zi, 0, D - 1)
        ycl = jnp.clip(yi, 0, H - 1)
        xcl = jnp.clip(xi, 0, W - 1)
        vals = vol[:, zcl, ycl, xcl]                      # (C, D, H, W)
        return vals * valid[None].astype(vol.dtype)

    out = jnp.zeros_like(vol)
    for dz, wz in ((0, 1.0 - fz), (1, fz)):
        for dy, wy in ((0, 1.0 - fy), (1, fy)):
            for dx, wx in ((0, 1.0 - fx), (1, fx)):
                w = (wz * wy * wx)[None].astype(vol.dtype)
                out = out + gather(z0 + dz, y0 + dy, x0 + dx) * w
    return out


def trans_filter(weight1, output_rot_dim):
    """weight1: (1, C_in, r_in, K, K) -> rotated filters (1, r_out, C_in, r_in, K, K)."""
    _, C, D, H, W = weight1.shape
    vol = weight1[0]
    # normalized output voxel-centre coordinates (align_corners=False)
    xs = (2.0 * np.arange(W) + 1.0) / W - 1.0
    ys = (2.0 * np.arange(H) + 1.0) / H - 1.0
    zs = (2.0 * np.arange(D) + 1.0) / D - 1.0
    zg, yg, xg = np.meshgrid(zs, ys, xs, indexing="ij")   # (D, H, W)

    rot_filters = []
    d_theta = 2.0 * np.pi / output_rot_dim
    for i in range(output_rot_dim):
        th = d_theta * i
        c, s = np.cos(th), np.sin(th)
        x_in = c * xg + s * yg
        y_in = -s * xg + c * yg
        z_in = np.zeros_like(xg)          # third affine row is all zeros in the reference
        ix = ((x_in + 1.0) * W - 1.0) / 2.0
        iy = ((y_in + 1.0) * H - 1.0) / 2.0
        iz = ((z_in + 1.0) * D - 1.0) / 2.0
        rot_filters.append(
            _trilinear_grid_sample(vol,
                                   jnp.asarray(ix, jnp.float32),
                                   jnp.asarray(iy, jnp.float32),
                                   jnp.asarray(iz, jnp.float32)))
    return jnp.stack(rot_filters, axis=0)[None]           # (1, r_out, C, r_in, K, K)


# ------------------------------ fused Pallas kernel ------------------------------

def _make_fused_kernel(Tb, G, K, H, W, ph, pw, mxu_dtype):
    """Fused (depthwise KxK + 1x1 mix + bias) kernel for Tb batch elements per grid step.

    Refs (per grid step):
      x_ref : (Tb, G, H*W)   spatially flattened, unpadded input (lane-dense)
      w_ref : (P, R)         combined weight, columns ordered (kh, kw, g); R = K*K*G (no pad)
      b_ref : (P, 1)         bias per flat output channel (VPU broadcast after the matmul)
      o_ref : (Tb, P, No)    over-wide lane-dense output, No = Ho*Wp (garbage cols dropped in wrapper)
    Scratch:
      pad_s : (Tb, G, Lf)    flattened zero-padded slab, Lf = Hp*Wp + (K-1)
      im_s  : (R, Tb*No)     im2col matrix (exactly R rows; no explicit zero padding)
    """
    Hp, Wp = H + 2 * ph, W + 2 * pw
    Ho, Wo = Hp - K + 1, Wp - K + 1
    No = Ho * Wp                    # over-wide flat output: K-1 garbage cols per output row
    Lf = Hp * Wp + (K - 1)          # + tail so every tap slice stays in-bounds
    R = K * K * G

    def kernel(x_ref, w_ref, b_ref, o_ref, pad_s, im_s):
        # 1) zero-padded, spatially-flattened input slab in VMEM.  Full zero each step is a
        #    few KB (border + tail); the interior is fully rewritten below.  Zeroing per step
        #    (not "once") keeps v7x megacore-private scratch safe.
        pad_s[...] = jnp.zeros(pad_s.shape, pad_s.dtype)
        # TODO(synk): for production H,W replace these fully-unrolled copies with
        # lax.fori_loop(..., unroll=True) (or DMA row placement on v5e) to bound code size.
        for b in range(Tb):
            for h in range(H):
                dst = (ph + h) * Wp + pw
                pad_s[b, :, dst:dst + W] = x_ref[b, :, h * W:(h + 1) * W]

        # 2) im2col rows: tap (kh, kw) is a *contiguous* lane slice of the flat slab shifted
        #    by kh*Wp + kw.  Columns j with (j % Wp) >= Wo wrap across rows (garbage) and are
        #    sliced off in the wrapper.  Row order (kh, kw, g) matches the host-side weight
        #    column order.  R = K*K*G exactly: no tail rows to zero.
        for b in range(Tb):
            for kh in range(K):
                for kw in range(K):
                    tap = kh * K + kw
                    off = kh * Wp + kw
                    im_s[tap * G:(tap + 1) * G, b * No:(b + 1) * No] = (
                        pad_s[b, :, off:off + No].astype(mxu_dtype))

        # 3) single MXU contraction (depth K*K*G), f32 accumulation; bias as (P,1) broadcast.
        y = jnp.dot(w_ref[...], im_s[...], preferred_element_type=jnp.float32)
        y = y + b_ref[...]

        # 4) one lane-dense (P, No) store per batch element (no per-row column-drop loop).
        for b in range(Tb):
            o_ref[b, :, :] = y[:, b * No:(b + 1) * No].astype(o_ref.dtype)

    return kernel, (Hp, Wp, Ho, Wo, No, Lf, R)


def _choose_batch_tile(B, max_tb=8):
    """Largest divisor of B (capped) that still leaves >= 2 grid steps (v7x megacore)."""
    best = 1
    for tb in range(1, min(B, max_tb) + 1):
        if B % tb == 0 and B // tb >= 2:
            best = tb
    return best


# ------------------------------ module wrapper ------------------------------

class GroupConvSepPallas:
    def __init__(self, in_channels, out_channels, kernel_size, stride=1, padding=0,
                 bias=True, input_rot_dim=1, output_rot_dim=4, key=None,
                 mxu_dtype=jnp.float32):
        self.in_channels = in_channels
        self.out_channels = out_channels
        self.ksize = kernel_size
        self.stride = stride if isinstance(stride, tuple) else (stride, stride)
        self.padding = padding if isinstance(padding, tuple) else (padding, padding)
        self.input_rot_dim = input_rot_dim
        self.output_rot_dim = output_rot_dim
        # mxu_dtype=jnp.bfloat16 halves weight/im2col VMEM + DMA; default f32 keeps the
        # numerical check comfortably inside tolerance.
        self.mxu_dtype = mxu_dtype

        n = in_channels * kernel_size * kernel_size
        stdv = 1.0 / math.sqrt(n)
        k1, k2, k3 = jax.random.split(key, 3)
        self.weight1 = jax.random.uniform(
            k1, (1, in_channels, input_rot_dim, kernel_size, kernel_size),
            jnp.float32, -stdv, stdv)
        self.weight2 = jax.random.uniform(
            k2, (output_rot_dim, out_channels, in_channels, output_rot_dim,
                 input_rot_dim, 1, 1), jnp.float32, -stdv, stdv)
        self.bias = (jax.random.uniform(k3, (out_channels,), jnp.float32, -stdv, stdv)
                     if bias else None)

        # ------- parameter-only precomputation (once, not per forward call) -------
        C_in, r_in, r_out, K = in_channels, input_rot_dim, output_rot_dim, kernel_size
        G = C_in * r_in                 # grouped-conv groups == padded-input channels
        Q = G * r_out                   # depthwise output channels (flat reference order)
        P = r_out * out_channels        # final flat output channels (flat reference order)

        tw1 = trans_filter(self.weight1, r_out).reshape(Q, K, K)    # flat q = (r_out, C_in, r_in)
        tw2 = self.weight2.reshape(P, Q)                            # same flat orders as reference views
        # Fold depthwise + 1x1: grouped-conv output channel q reads input channel q // r_out,
        # i.e. flat q blocks of size r_out share one input channel g.  Sum each block:
        #   W_comb[p, kh, kw, g] = sum_r tw2[p, g*r_out + r] * tw1[g*r_out + r, kh, kw]
        W_comb = jnp.einsum("pgr,grkl->pklg",
                            tw2.reshape(P, G, r_out),
                            tw1.reshape(G, r_out, K, K))            # (P, K, K, G)
        self.W_rows = W_comb.reshape(P, K * K * G).astype(mxu_dtype)  # column order = (kh, kw, g)

        b = self.bias if self.bias is not None else jnp.zeros((out_channels,), jnp.float32)
        # After the final .view(B, C_out, r_out, H, W), flat channel p gets bias[p // r_out].
        self.bias_col = jnp.repeat(b, r_out).reshape(P, 1).astype(jnp.float32)

        self.G, self.Q, self.P, self.R = G, Q, P, K * K * G

    def __call__(self, x):
        # x: (B, in_channels * input_rot_dim, H, W)  -- same as PyTorch after .view
        B, C, H, W = x.shape
        G, P, K = self.G, self.P, self.ksize
        assert C == G, (C, G)
        if self.stride != (1, 1):
            # TODO(synk): strided output not supported by the fused flat-window formulation.
            raise NotImplementedError("stride > 1 not supported in the Pallas kernel")
        ph, pw = self.padding

        Tb = _choose_batch_tile(B)
        kernel, (Hp, Wp, Ho, Wo, No, Lf, R) = _make_fused_kernel(
            Tb, G, K, H, W, ph, pw, self.mxu_dtype)

        # Contiguous (free) reshape: input enters the kernel lane-dense as (G, H*W).
        x_flat = x.reshape(B, G, H * W)

        # TODO(synk): for production H,W add Ho row-block tiling (grid=(B//Tb, cdiv(Ho,Tho))
        # with a K-1 input-row halo in the index_map) so per-step VMEM stays within v7x's
        # 64 MiB; toy sizes fit comfortably with defaults.
        y_wide = pl.pallas_call(
            kernel,
            out_shape=jax.ShapeDtypeStruct((B, P, No), jnp.float32),
            grid=(B // Tb,),
            in_specs=[pl.BlockSpec((Tb, G, H * W), lambda i: (i, 0, 0)),
                      pl.BlockSpec((P, R), lambda i: (0, 0)),
                      pl.BlockSpec((P, 1), lambda i: (0, 0))],
            out_specs=pl.BlockSpec((Tb, P, No), lambda i: (i, 0, 0)),
            scratch_shapes=[pltpu.VMEM((Tb, G, Lf), jnp.float32),
                            pltpu.VMEM((R, Tb * No), self.mxu_dtype)],
            compiler_params=pltpu.CompilerParams(
                dimension_semantics=("parallel",)),
        )(x_flat, self.W_rows, self.bias_col)

        # Drop the K-1 wrap-around columns per output row (cheap XLA slice, fuses downstream),
        # then split flat P channels -> (C_out, r_out), exactly like the reference's final .view
        y = y_wide.reshape(B, P, Ho, Wp)[..., :Wo]
        return y.reshape(B, self.out_channels, self.output_rot_dim, Ho, Wo)


# ------------------------- plain-XLA reference (for checking) -------------------------

def reference_forward(module, x):
    """Mirror of the PyTorch forward using lax convolutions (no Pallas)."""
    C_in, C_out = module.in_channels, module.out_channels
    r_in, r_out, K = module.input_rot_dim, module.output_rot_dim, module.ksize
    G = C_in * r_in
    Q = G * r_out
    P = C_out * r_out
    ph, pw = module.padding
    tw1 = trans_filter(module.weight1, r_out).reshape(Q, 1, K, K)
    tw2 = module.weight2.reshape(P, Q, 1, 1)
    y1 = jax.lax.conv_general_dilated(
        x, tw1, window_strides=module.stride, padding=[(ph, ph), (pw, pw)],
        feature_group_count=G, dimension_numbers=("NCHW", "OIHW", "NCHW"),
        precision=jax.lax.Precision.HIGHEST)
    y2 = jax.lax.conv_general_dilated(
        y1, tw2, window_strides=(1, 1), padding="VALID",
        dimension_numbers=("NCHW", "OIHW", "NCHW"),
        precision=jax.lax.Precision.HIGHEST)
    B, _, Ho, Wo = y2.shape
    y2 = y2.reshape(B, C_out, r_out, Ho, Wo)
    if module.bias is not None:
        y2 = y2 + module.bias.reshape(1, C_out, 1, 1, 1)
    return y2


# ------------------------------------ main ----------------------------------

if __name__ == "__main__":
    key = jax.random.PRNGKey(0)
    k_param, k_x = jax.random.split(key)

    B, C_in, C_out, H, W = 2, 4, 4, 16, 16
    module = GroupConvSepPallas(C_in, C_out, kernel_size=3, stride=1, padding=1,
                                bias=True, input_rot_dim=1, output_rot_dim=4,
                                key=k_param)

    x = jax.random.normal(k_x, (B, C_in * module.input_rot_dim, H, W), jnp.float32)
    y = module(x)
    jax.block_until_ready(y)
    assert y.shape == (B, C_out, module.output_rot_dim, H, W), y.shape
    assert y.dtype == jnp.float32

    # numerical check of the fused kernel against the plain-XLA reference forward
    y_ref = reference_forward(module, x)
    err = float(jnp.max(jnp.abs(y - y_ref)))
    assert err < 5e-3, f"max abs error vs reference: {err}"

    print("KERNEL_OK")
</pallas_src>

<mosaic_0001>
module attributes {stable_mosaic.version = 11 : i64} {
  func.func @kernel(%arg0: i32, %arg1: memref<1x4x256xf32, #tpu.memory_space<vmem>>, %arg2: memref<16x36xf32, #tpu.memory_space<vmem>>, %arg3: memref<16x1xf32, #tpu.memory_space<vmem>>, %arg4: memref<1x16x288xf32, #tpu.memory_space<vmem>>, %arg5: memref<1x4x326xf32, #tpu.memory_space<vmem>>, %arg6: memref<36x288xf32, #tpu.memory_space<vmem>>) attributes {dimension_semantics = [#tpu.dimension_semantics<parallel>], iteration_bounds = array<i64: 2>, scalar_prefetch = 0 : i64, scratch_operands = 2 : i64, tpu.core_type = #tpu.core_type<tc>, window_params = [{transform_indices = @transform_0, window_bounds = array<i64: 1, 4, 256>}, {pipeline_mode = #tpu.pipeline_mode<synchronous>, transform_indices = @transform_1, window_bounds = array<i64: 16, 36>}, {pipeline_mode = #tpu.pipeline_mode<synchronous>, transform_indices = @transform_2, window_bounds = array<i64: 16, 1>}, {transform_indices = @transform_3, window_bounds = array<i64: 1, 16, 288>}]} {
    %cst = arith.constant 0.000000e+00 : f32
    %0 = vector.broadcast %cst : f32 to vector<1x4x326xf32>
    %c0 = arith.constant 0 : index
    %c0_0 = arith.constant 0 : index
    %c0_1 = arith.constant 0 : index
    %1 = vector.load %arg5[%c0, %c0_0, %c0_1] : memref<1x4x326xf32, #tpu.memory_space<vmem>>, vector<1x4x326xf32>
    tpu.vector_store %arg5[%c0, %c0_0, %c0_1], %0 {strides = array<i32>} : memref<1x4x326xf32, #tpu.memory_space<vmem>>, vector<1x4x326xf32>,
    %c0_2 = arith.constant 0 : index
    %c0_3 = arith.constant 0 : index
    %c0_4 = arith.constant 0 : index
    %2 = vector.load %arg1[%c0_2, %c0_3, %c0_4] : memref<1x4x256xf32, #tpu.memory_space<vmem>>, vector<1x4x16xf32>
    %3 = vector.shape_cast %2 : vector<1x4x16xf32> to vector<4x16xf32>
    %c0_5 = arith.constant 0 : index
    %c0_6 = arith.constant 0 : index
    %c19 = arith.constant 19 : index
    %4 = vector.load %arg5[%c0_5, %c0_6, %c19] : memref<1x4x326xf32, #tpu.memory_space<vmem>>, vector<1x4x16xf32>
    %5 = vector.shape_cast %4 : vector<1x4x16xf32> to vector<4x16xf32>
    %6 = vector.shape_cast %3 : vector<4x16xf32> to vector<1x4x16xf32>
    tpu.vector_store %arg5[%c0_5, %c0_6, %c19], %6 {strides = array<i32>} : memref<1x4x326xf32, #tpu.memory_space<vmem>>, vector<1x4x16xf32>,
    %c0_7 = arith.constant 0 : index
    %c0_8 = arith.constant 0 : index
    %c16 = arith.constant 16 : index
    %7 = vector.load %arg1[%c0_7, %c0_8, %c16] : memref<1x4x256xf32, #tpu.memory_space<vmem>>, vector<1x4x16xf32>
    %8 = vector.shape_cast %7 : vector<1x4x16xf32> to vector<4x16xf32>
    %c0_9 = arith.constant 0 : index
    %c0_10 = arith.constant 0 : index
    %c37 = arith.constant 37 : index
    %9 = vector.load %arg5[%c0_9, %c0_10, %c37] : memref<1x4x326xf32, #tpu.memory_space<vmem>>, vector<1x4x16xf32>
    %10 = vector.shape_cast %9 : vector<1x4x16xf32> to vector<4x16xf32>
    %11 = vector.shape_cast %8 : vector<4x16xf32> to vector<1x4x16xf32>
    tpu.vector_store %arg5[%c0_9, %c0_10, %c37], %11 {strides = array<i32>} : memref<1x4x326xf32, #tpu.memory_space<vmem>>, vector<1x4x16xf32>,
    %c0_11 = arith.constant 0 : index
    %c0_12 = arith.constant 0 : index
    %c32 = arith.constant 32 : index
    %12 = vector.load %arg1[%c0_11, %c0_12, %c32] : memref<1x4x256xf32, #tpu.memory_space<vmem>>, vector<1x4x16xf32>
    %13 = vector.shape_cast %12 : vector<1x4x16xf32> to vector<4x16xf32>
    %c0_13 = arith.constant 0 : index
    %c0_14 = arith.constant 0 : index
    %c55 = arith.constant 55 : index
    %14 = vector.load %arg5[%c0_13, %c0_14, %c55] : memref<1x4x326xf32, #tpu.memory_space<vmem>>, vector<1x4x16xf32>
    %15 = vector.shape_cast %14 : vector<1x4x16xf32> to vector<4x16xf32>
    %16 = vector.shape_cast %13 : vector<4x16xf32> to vector<1x4x16xf32>
    tpu.vector_store %arg5[%c0_13, %c0_14, %c55], %16 {strides = array<i32>} : memref<1x4x326xf32, #tpu.memory_space<vmem>>, vector<1x4x16xf32>,
    %c0_15 = arith.constant 0 : index
    %c0_16 = arith.constant 0 : index
    %c48 = arith.constant 48 : index
    %17 = vector.load %arg1[%c0_15, %c0_16, %c48] : memref<1x4x256xf32, #tpu.memory_space<vmem>>, vector<1x4x16xf32>
    %18 = vector.shape_cast %17 : vector<1x4x16xf32> to vector<4x16xf32>
    %c0_17 = arith.constant 0 : index
    %c0_18 = arith.constant 0 : index
    %c73 = arith.constant 73 : index
    %19 = vector.load %arg5[%c0_17, %c0_18, %c73] : memref<1x4x326xf32, #tpu.memory_space<vmem>>, vector<1x4x16xf32>
    %20 = vector.shape_cast %19 : vector<1x4x16xf32> to vector<4x16xf32>
    %21 = vector.shape_cast %18 : vector<4x16xf32> to vector<1x4x16xf32>
    tpu.vector_store %arg5[%c0_17, %c0_18, %c73], %21 {strides = array<i32>} : memref<1x4x326xf32, #tpu.memory_space<vmem>>, vector<1x4x16xf32>,
    %c0_19 = arith.constant 0 : index
    %c0_20 = arith.constant 0 : index
    %c64 = arith.constant 64 : index
    %22 = vector.load %arg1[%c0_19, %c0_20, %c64] : memref<1x4x256xf32, #tpu.memory_space<vmem>>, vector<1x4x16xf32>
    %23 = vector.shape_cast %22 : vector<1x4x16xf32> to vector<4x16xf32>
    %c0_21 = arith.constant 0 : index
    %c0_22 = arith.constant 0 : index
    %c91 = arith.constant 91 : index
    %24 = vector.load %arg5[%c0_21, %c0_22, %c91] : memref<1x4x326xf32, #tpu.memory_space<vmem>>, vector<1x4x16xf32>
    %25 = vector.shape_cast %24 : vector<1x4x16xf32> to vector<4x16xf32>
    %26 = vector.shape_cast %23 : vector<4x16xf32> to vector<1x4x16xf32>
    tpu.vector_store %arg5[%c0_21, %c0_22, %c91], %26 {strides = array<i32>} : memref<1x4x326xf32, #tpu.memory_space<vmem>>, vector<1x4x16xf32>,
    %c0_23 = arith.constant 0 : index
    %c0_24 = arith.constant 0 : index
    %c80 = arith.constant 80 : index
    %27 = vector.load %arg1[%c0_23, %c0_24, %c80] : memref<1x4x256xf32, #tpu.memory_space<vmem>>, vector<1x4x16xf32>
    %28 = vector.shape_cast %27 : vector<1x4x16xf32> to vector<4x16xf32>
    %c0_25 = arith.constant 0 : index
    %c0_26 = arith.constant 0 : index
    %c109 = arith.constant 109 : index
    %29 = vector.load %arg5[%c0_25, %c0_26, %c109] : memref<1x4x326xf32, #tpu.memory_space<vmem>>, vector<1x4x16xf32>
    %30 = vector.shape_cast %29 : vector<1x4x16xf32> to vector<4x16xf32>
    %31 = vector.shape_cast %28 : vector<4x16xf32> to vector<1x4x16xf32>
    tpu.vector_store %arg5[%c0_25, %c0_26, %c109], %31 {strides = array<i32>} : memref<1x4x326xf32, #tpu.memory_space<vmem>>, vector<1x4x16xf32>,
    %c0_27 = arith.constant 0 : index
    %c0_28 = arith.constant 0 : index
    %c96 = arith.constant 96 : index
    %32 = vector.load %arg1[%c0_27, %c0_28, %c96] : memref<1x4x256xf32, #tpu.memory_space<vmem>>, vector<1x4x16xf32>
    %33 = vector.shape_cast %32 : vector<1x4x16xf32> to vector<4x16xf32>
    %c0_29 = arith.constant 0 : index
    %c0_30 = arith.constant 0 : index
    %c127 = arith.constant 127 : index
    %34 = vector.load %arg5[%c0_29, %c0_30, %c127] : memref<1x4x326xf32, #tpu.memory_space<vmem>>, vector<1x4x16xf32>
    %35 = vector.shape_cast %34 : vector<1x4x16xf32> to vector<4x16xf32>
    %36 = vector.shape_cast %33 : vector<4x16xf32> to vector<1x4x16xf32>
    tpu.vector_store %arg5[%c0_29, %c0_30, %c127], %36 {strides = array<i32>} : memref<1x4x326xf32, #tpu.memory_space<vmem>>, vector<1x4x16xf32>,
    %c0_31 = arith.constant 0 : index
    %c0_32 = arith.constant 0 : index
    %c112 = arith.constant 112 : index
    %37 = vector.load %arg1[%c0_31, %c0_32, %c112] : memref<1x4x256xf32, #tpu.memory_space<vmem>>, vector<1x4x16xf32>
    %38 = vector.shape_cast %37 : vector<1x4x16xf32> to vector<4x16xf32>
    %c0_33 = arith.constant 0 : index
    %c0_34 = arith.constant 0 : index
    %c145 = arith.constant 145 : index
    %39 = vector.load %arg5[%c0_33, %c0_34, %c145] : memref<1x4x326xf32, #tpu.memory_space<vmem>>, vector<1x4x16xf32>
    %40 = vector.shape_cast %39 : vector<1x4x16xf32> to vector<4x16xf32>
    %41 = vector.shape_cast %38 : vector<4x16xf32> to vector<1x4x16xf32>
    tpu.vector_store %arg5[%c0_33, %c0_34, %c145], %41 {strides = array<i32>} : memref<1x4x326xf32, #tpu.memory_space<vmem>>, vector<1x4x16xf32>,
    %c0_35 = arith.constant 0 : index
    %c0_36 = arith.constant 0 : index
    %c128 = arith.constant 128 : index
    %42 = vector.load %arg1[%c0_35, %c0_36, %c128] : memref<1x4x256xf32, #tpu.memory_space<vmem>>, vector<1x4x16xf32>
    %43 = vector.shape_cast %42 : vector<1x4x16xf32> to vector<4x16xf32>
    %c0_37 = arith.constant 0 : index
    %c0_38 = arith.constant 0 : index
    %c163 = arith.constant 163 : index
    %44 = vector.load %arg5[%c0_37, %c0_38, %c163] : memref<1x4x326xf32, #tpu.memory_space<vmem>>, vector<1x4x16xf32>
    %45 = vector.shape_cast %44 : vector<1x4x16xf32> to vector<4x16xf32>
    %46 = vector.shape_cast %43 : vector<4x16xf32> to vector<1x4x16xf32>
    tpu.vector_store %arg5[%c0_37, %c0_38, %c163], %46 {strides = array<i32>} : memref<1x4x326xf32, #tpu.memory_space<vmem>>, vector<1x4x16xf32>,
    %c0_39 = arith.constant 0 : index
    %c0_40 = arith.constant 0 : index
    %c144 = arith.constant 144 : index
    %47 = vector.load %arg1[%c0_39, %c0_40, %c144] : memref<1x4x256xf32, #tpu.memory_space<vmem>>, vector<1x4x16xf32>
    %48 = vector.shape_cast %47 : vector<1x4x16xf32> to vector<4x16xf32>
    %c0_41 = arith.constant 0 : index
    %c0_42 = arith.constant 0 : index
    %c181 = arith.constant 181 : index
    %49 = vector.load %arg5[%c0_41, %c0_42, %c181] : memref<1x4x326xf32, #tpu.memory_space<vmem>>, vector<1x4x16xf32>
    %50 = vector.shape_cast %49 : vector<1x4x16xf32> to vector<4x16xf32>
    %51 = vector.shape_cast %48 : vector<4x16xf32> to vector<1x4x16xf32>
    tpu.vector_store %arg5[%c0_41, %c0_42, %c181], %51 {strides = array<i32>} : memref<1x4x326xf32, #tpu.memory_space<vmem>>, vector<1x4x16xf32>,
    %c0_43 = arith.constant 0 : index
    %c0_44 = arith.constant 0 : index
    %c160 = arith.constant 160 : index
    %52 = vector.load %arg1[%c0_43, %c0_44, %c160] : memref<1x4x256xf32, #tpu.memory_space<vmem>>, vector<1x4x16xf32>
    %53 = vector.shape_cast %52 : vector<1x4x16xf32> to vector<4x16xf32>
    %c0_45 = arith.constant 0 : index
    %c0_46 = arith.constant 0 : index
    %c199 = arith.constant 199 : index
    %54 = vector.load %arg5[%c0_45, %c0_46, %c199] : memref<1x4x326xf32, #tpu.memory_space<vmem>>, vector<1x4x16xf32>
    %55 = vector.shape_cast %54 : vector<1x4x16xf32> to vector<4x16xf32>
    %56 = vector.shape_cast %53 : vector<4x16xf32> to vector<1x4x16xf32>
    tpu.vector_store %arg5[%c0_45, %c0_46, %c199], %56 {strides = array<i32>} : memref<1x4x326xf32, #tpu.memory_space<vmem>>, vector<1x4x16xf32>,
    %c0_47 = arith.constant 0 : index
    %c0_48 = arith.constant 0 : index
    %c176 = arith.constant 176 : index
    %57 = vector.load %arg1[%c0_47, %c0_48, %c176] : memref<1x4x256xf32, #tpu.memory_space<vmem>>, vector<1x4x16xf32>
    %58 = vector.shape_cast %57 : vector<1x4x16xf32> to vector<4x16xf32>
    %c0_49 = arith.constant 0 : index
    %c0_50 = arith.constant 0 : index
    %c217 = arith.constant 217 : index
    %59 = vector.load %arg5[%c0_49, %c0_50, %c217] : memref<1x4x326xf32, #tpu.memory_space<vmem>>, vector<1x4x16xf32>
    %60 = vector.shape_cast %59 : vector<1x4x16xf32> to vector<4x16xf32>
    %61 = vector.shape_cast %58 : vector<4x16xf32> to vector<1x4x16xf32>
    tpu.vector_store %arg5[%c0_49, %c0_50, %c217], %61 {strides = array<i32>} : memref<1x4x326xf32, #tpu.memory_space<vmem>>, vector<1x4x16xf32>,
    %c0_51 = arith.constant 0 : index
    %c0_52 = arith.constant 0 : index
    %c192 = arith.constant 192 : index
    %62 = vector.load %arg1[%c0_51, %c0_52, %c192] : memref<1x4x256xf32, #tpu.memory_space<vmem>>, vector<1x4x16xf32>
    %63 = vector.shape_cast %62 : vector<1x4x16xf32> to vector<4x16xf32>
    %c0_53 = arith.constant 0 : index
    %c0_54 = arith.constant 0 : index
    %c235 = arith.constant 235 : index
    %64 = vector.load %arg5[%c0_53, %c0_54, %c235] : memref<1x4x326xf32, #tpu.memory_space<vmem>>, vector<1x4x16xf32>
    %65 = vector.shape_cast %64 : vector<1x4x16xf32> to vector<4x16xf32>
    %66 = vector.shape_cast %63 : vector<4x16xf32> to vector<1x4x16xf32>
    tpu.vector_store %arg5[%c0_53, %c0_54, %c235], %66 {strides = array<i32>} : memref<1x4x326xf32, #tpu.memory_space<vmem>>, vector<1x4x16xf32>,
    %c0_55 = arith.constant 0 : index
    %c0_56 = arith.constant 0 : index
    %c208 = arith.constant 208 : index
    %67 = vector.load %arg1[%c0_55, %c0_56, %c208] : memref<1x4x256xf32, #tpu.memory_space<vmem>>, vector<1x4x16xf32>
    %68 = vector.shape_cast %67 : vector<1x4x16xf32> to vector<4x16xf32>
    %c0_57 = arith.constant 0 : index
    %c0_58 = arith.constant 0 : index
    %c253 = arith.constant 253 : index
    %69 = vector.load %arg5[%c0_57, %c0_58, %c253] : memref<1x4x326xf32, #tpu.memory_space<vmem>>, vector<1x4x16xf32>
    %70 = vector.shape_cast %69 : vector<1x4x16xf32> to vector<4x16xf32>
    %71 = vector.shape_cast %68 : vector<4x16xf32> to vector<1x4x16xf32>
    tpu.vector_store %arg5[%c0_57, %c0_58, %c253], %71 {strides = array<i32>} : memref<1x4x326xf32, #tpu.memory_space<vmem>>, vector<1x4x16xf32>,
    %c0_59 = arith.constant 0 : index
    %c0_60 = arith.constant 0 : index
    %c224 = arith.constant 224 : index
    %72 = vector.load %arg1[%c0_59, %c0_60, %c224] : memref<1x4x256xf32, #tpu.memory_space<vmem>>, vector<1x4x16xf32>
    %73 = vector.shape_cast %72 : vector<1x4x16xf32> to vector<4x16xf32>
    %c0_61 = arith.constant 0 : index
    %c0_62 = arith.constant 0 : index
    %c271 = arith.constant 271 : index
    %74 = vector.load %arg5[%c0_61, %c0_62, %c271] : memref<1x4x326xf32, #tpu.memory_space<vmem>>, vector<1x4x16xf32>
    %75 = vector.shape_cast %74 : vector<1x4x16xf32> to vector<4x16xf32>
    %76 = vector.shape_cast %73 : vector<4x16xf32> to vector<1x4x16xf32>
    tpu.vector_store %arg5[%c0_61, %c0_62, %c271], %76 {strides = array<i32>} : memref<1x4x326xf32, #tpu.memory_space<vmem>>, vector<1x4x16xf32>,
    %c0_63 = arith.constant 0 : index
    %c0_64 = arith.constant 0 : index
    %c240 = arith.constant 240 : index
    %77 = vector.load %arg1[%c0_63, %c0_64, %c240] : memref<1x4x256xf32, #tpu.memory_space<vmem>>, vector<1x4x16xf32>
    %78 = vector.shape_cast %77 : vector<1x4x16xf32> to vector<4x16xf32>
    %c0_65 = arith.constant 0 : index
    %c0_66 = arith.constant 0 : index
    %c289 = arith.constant 289 : index
    %79 = vector.load %arg5[%c0_65, %c0_66, %c289] : memref<1x4x326xf32, #tpu.memory_space<vmem>>, vector<1x4x16xf32>
    %80 = vector.shape_cast %79 : vector<1x4x16xf32> to vector<4x16xf32>
    %81 = vector.shape_cast %78 : vector<4x16xf32> to vector<1x4x16xf32>
    tpu.vector_store %arg5[%c0_65, %c0_66, %c289], %81 {strides = array<i32>} : memref<1x4x326xf32, #tpu.memory_space<vmem>>, vector<1x4x16xf32>,
    %c0_67 = arith.constant 0 : index
    %c0_68 = arith.constant 0 : index
    %c0_69 = arith.constant 0 : index
    %82 = vector.load %arg5[%c0_67, %c0_68, %c0_69] : memref<1x4x326xf32, #tpu.memory_space<vmem>>, vector<1x4x288xf32>
    %83 = vector.shape_cast %82 : vector<1x4x288xf32> to vector<4x288xf32>
    %c0_70 = arith.constant 0 : index
    %c0_71 = arith.constant 0 : index
    %84 = vector.load %arg6[%c0_70, %c0_71] : memref<36x288xf32, #tpu.memory_space<vmem>>, vector<4x288xf32>
    tpu.vector_store %arg6[%c0_70, %c0_71], %83 {strides = array<i32>} : memref<36x288xf32, #tpu.memory_space<vmem>>, vector<4x288xf32>,
    %c0_72 = arith.constant 0 : index
    %c0_73 = arith.constant 0 : index
    %c1 = arith.constant 1 : index
    %85 = vector.load %arg5[%c0_72, %c0_73, %c1] : memref<1x4x326xf32, #tpu.memory_space<vmem>>, vector<1x4x288xf32>
    %86 = vector.shape_cast %85 : vector<1x4x288xf32> to vector<4x288xf32>
    %c4 = arith.constant 4 : index
    %c0_74 = arith.constant 0 : index
    %87 = vector.load %arg6[%c4, %c0_74] : memref<36x288xf32, #tpu.memory_space<vmem>>, vector<4x288xf32>
    tpu.vector_store %arg6[%c4, %c0_74], %86 {strides = array<i32>} : memref<36x288xf32, #tpu.memory_space<vmem>>, vector<4x288xf32>,
    %c0_75 = arith.constant 0 : index
    %c0_76 = arith.constant 0 : index
    %c2 = arith.constant 2 : index
    %88 = vector.load %arg5[%c0_75, %c0_76, %c2] : memref<1x4x326xf32, #tpu.memory_space<vmem>>, vector<1x4x288xf32>
    %89 = vector.shape_cast %88 : vector<1x4x288xf32> to vector<4x288xf32>
    %c8 = arith.constant 8 : index
    %c0_77 = arith.constant 0 : index
    %90 = vector.load %arg6[%c8, %c0_77] : memref<36x288xf32, #tpu.memory_space<vmem>>, vector<4x288xf32>
    tpu.vector_store %arg6[%c8, %c0_77], %89 {strides = array<i32>} : memref<36x288xf32, #tpu.memory_space<vmem>>, vector<4x288xf32>,
    %c0_78 = arith.constant 0 : index
    %c0_79 = arith.constant 0 : index
    %c18 = arith.constant 18 : index
    %91 = vector.load %arg5[%c0_78, %c0_79, %c18] : memref<1x4x326xf32, #tpu.memory_space<vmem>>, vector<1x4x288xf32>
    %92 = vector.shape_cast %91 : vector<1x4x288xf32> to vector<4x288xf32>
    %c12 = arith.constant 12 : index
    %c0_80 = arith.constant 0 : index
    %93 = vector.load %arg6[%c12, %c0_80] : memref<36x288xf32, #tpu.memory_space<vmem>>, vector<4x288xf32>
    tpu.vector_store %arg6[%c12, %c0_80], %92 {strides = array<i32>} : memref<36x288xf32, #tpu.memory_space<vmem>>, vector<4x288xf32>,
    %c0_81 = arith.constant 0 : index
    %c0_82 = arith.constant 0 : index
    %c19_83 = arith.constant 19 : index
    %94 = vector.load %arg5[%c0_81, %c0_82, %c19_83] : memref<1x4x326xf32, #tpu.memory_space<vmem>>, vector<1x4x288xf32>
    %95 = vector.shape_cast %94 : vector<1x4x288xf32> to vector<4x288xf32>
    %c16_84 = arith.constant 16 : index
    %c0_85 = arith.constant 0 : index
    %96 = vector.load %arg6[%c16_84, %c0_85] : memref<36x288xf32, #tpu.memory_space<vmem>>, vector<4x288xf32>
    tpu.vector_store %arg6[%c16_84, %c0_85], %95 {strides = array<i32>} : memref<36x288xf32, #tpu.memory_space<vmem>>, vector<4x288xf32>,
    %c0_86 = arith.constant 0 : index
    %c0_87 = arith.constant 0 : index
    %c20 = arith.constant 20 : index
    %97 = vector.load %arg5[%c0_86, %c0_87, %c20] : memref<1x4x326xf32, #tpu.memory_space<vmem>>, vector<1x4x288xf32>
    %98 = vector.shape_cast %97 : vector<1x4x288xf32> to vector<4x288xf32>
    %c20_88 = arith.constant 20 : index
    %c0_89 = arith.constant 0 : index
    %99 = vector.load %arg6[%c20_88, %c0_89] : memref<36x288xf32, #tpu.memory_space<vmem>>, vector<4x288xf32>
    tpu.vector_store %arg6[%c20_88, %c0_89], %98 {strides = array<i32>} : memref<36x288xf32, #tpu.memory_space<vmem>>, vector<4x288xf32>,
    %c0_90 = arith.constant 0 : index
    %c0_91 = arith.constant 0 : index
    %c36 = arith.constant 36 : index
    %100 = vector.load %arg5[%c0_90, %c0_91, %c36] : memref<1x4x326xf32, #tpu.memory_space<vmem>>, vector<1x4x288xf32>
    %101 = vector.shape_cast %100 : vector<1x4x288xf32> to vector<4x288xf32>
    %c24 = arith.constant 24 : index
    %c0_92 = arith.constant 0 : index
    %102 = vector.load %arg6[%c24, %c0_92] : memref<36x288xf32, #tpu.memory_space<vmem>>, vector<4x288xf32>
    tpu.vector_store %arg6[%c24, %c0_92], %101 {strides = array<i32>} : memref<36x288xf32, #tpu.memory_space<vmem>>, vector<4x288xf32>,
    %c0_93 = arith.constant 0 : index
    %c0_94 = arith.constant 0 : index
    %c37_95 = arith.constant 37 : index
    %103 = vector.load %arg5[%c0_93, %c0_94, %c37_95] : memref<1x4x326xf32, #tpu.memory_space<vmem>>, vector<1x4x288xf32>
    %104 = vector.shape_cast %103 : vector<1x4x288xf32> to vector<4x288xf32>
    %c28 = arith.constant 28 : index
    %c0_96 = arith.constant 0 : index
    %105 = vector.load %arg6[%c28, %c0_96] : memref<36x288xf32, #tpu.memory_space<vmem>>, vector<4x288xf32>
    tpu.vector_store %arg6[%c28, %c0_96], %104 {strides = array<i32>} : memref<36x288xf32, #tpu.memory_space<vmem>>, vector<4x288xf32>,
    %c0_97 = arith.constant 0 : index
    %c0_98 = arith.constant 0 : index
    %c38 = arith.constant 38 : index
    %106 = vector.load %arg5[%c0_97, %c0_98, %c38] : memref<1x4x326xf32, #tpu.memory_space<vmem>>, vector<1x4x288xf32>
    %107 = vector.shape_cast %106 : vector<1x4x288xf32> to vector<4x288xf32>
    %c32_99 = arith.constant 32 : index
    %c0_100 = arith.constant 0 : index
    %108 = vector.load %arg6[%c32_99, %c0_100] : memref<36x288xf32, #tpu.memory_space<vmem>>, vector<4x288xf32>
    tpu.vector_store %arg6[%c32_99, %c0_100], %107 {strides = array<i32>} : memref<36x288xf32, #tpu.memory_space<vmem>>, vector<4x288xf32>,
    %c0_101 = arith.constant 0 : index
    %c0_102 = arith.constant 0 : index
    %109 = vector.load %arg2[%c0_101, %c0_102] : memref<16x36xf32, #tpu.memory_space<vmem>>, vector<16x36xf32>
    %c0_103 = arith.constant 0 : index
    %c0_104 = arith.constant 0 : index
    %110 = vector.load %arg6[%c0_103, %c0_104] : memref<36x288xf32, #tpu.memory_space<vmem>>, vector<36x288xf32>
    %cst_105 = arith.constant dense<0.000000e+00> : vector<16x288xf32>
    %111 = tpu.matmul %109, %110, %cst_105 {dimension_numbers = #tpu.dot_dimension_numbers<[1], [0], [0], [1], [0, 0, 1, 1], [], []>} : vector<16x36xf32>, vector<36x288xf32>, vector<16x288xf32> -> vector<16x288xf32>
    %c0_106 = arith.constant 0 : index
    %c0_107 = arith.constant 0 : index
    %112 = vector.load %arg3[%c0_106, %c0_107] : memref<16x1xf32, #tpu.memory_space<vmem>>, vector<16x1xf32>
    %113 = vector.broadcast %112 : vector<16x1xf32> to vector<16x288xf32>
    %114 = arith.addf %111, %113 : vector<16x288xf32>
    %c0_108 = arith.constant 0 : index
    %c0_109 = arith.constant 0 : index
    %c0_110 = arith.constant 0 : index
    %115 = vector.load %arg4[%c0_108, %c0_109, %c0_110] : memref<1x16x288xf32, #tpu.memory_space<vmem>>, vector<1x16x288xf32>
    %116 = vector.shape_cast %115 : vector<1x16x288xf32> to vector<16x288xf32>
    %117 = vector.shape_cast %114 : vector<16x288xf32> to vector<1x16x288xf32>
    tpu.vector_store %arg4[%c0_108, %c0_109, %c0_110], %117 {strides = array<i32>} : memref<1x16x288xf32, #tpu.memory_space<vmem>>, vector<1x16x288xf32>,
    return
  }
  func.func @transform_0(%arg0: i32) -> (i32, i32, i32) {
    %c0_i32 = arith.constant 0 : i32
    %c0_i32_0 = arith.constant 0 : i32
    %c0_i32_1 = arith.constant 0 : i32
    return %arg0, %c0_i32, %c0_i32_0 : i32, i32, i32
  }
  func.func @transform_1(%arg0: i32) -> (i32, i32) {
    %c0_i32 = arith.constant 0 : i32
    %c0_i32_0 = arith.constant 0 : i32
    %c0_i32_1 = arith.constant 0 : i32
    return %c0_i32, %c0_i32_0 : i32, i32
  }
  func.func @transform_2(%arg0: i32) -> (i32, i32) {
    %c0_i32 = arith.constant 0 : i32
    %c0_i32_0 = arith.constant 0 : i32
    %c0_i32_1 = arith.constant 0 : i32
    return %c0_i32, %c0_i32_0 : i32, i32
  }
  func.func @transform_3(%arg0: i32) -> (i32, i32, i32) {
    %c0_i32 = arith.constant 0 : i32
    %c0_i32_0 = arith.constant 0 : i32
    %c0_i32_1 = arith.constant 0 : i32
    return %arg0, %c0_i32, %c0_i32_0 : i32, i32, i32
  }
}

</mosaic_0001>

<bundles_post_ra>
// kernel: tpu_custom_call.1
= control target key start
LH: loop header
LB: loop body
LE: loop exit
PB: predicated region body
PF: predicated region fallthrough
CT: control target
= control target key end

     0   :  { %8 = vsyncpa [#allocation5], 0  ;;  %s1198_s0 = inlined_call_operand.vmem [shape: f32[2,4,256], index: 0, kind: input, shape index: {}]   ;;  %s1199_s1 = inlined_call_operand.hbm [shape: f32[16,36], index: 1, kind: input, shape index: {}]   ;;  %s1200_s2 = inlined_call_operand.vmem [shape: f32[16,1], index: 2, kind: input, shape index: {}]   ;;  %s1201_s3 = inlined_call_operand.hbm [shape: f32[2,16,288], index: 3, kind: output, shape index: {}]  }
   0x1   :  { %9 = vsyncpa [#allocation6], 0 }
   0x2   :  { %11 = vsyncpa [#allocation6 + $0x1], 0  ;;  %s1005_s12 = smov 0   ;;  %s1007_s13 = smov 0  }
   0x3   :  { %s1009_s14 = smov 0   ;;  %s1011_s15 = smov 0  }
   0x4 LB: > { %s1026_s16 = sadd.s32 4294967295, %s952_s15   ;;  %s745_s17 = sadd.s32 4294967294, %s952_s15   ;;  %s952_s15 = sphi %s1011_s15, %s1207_s15   ;;  %s948_s14 = sphi %s1009_s14, %s1206_s14   ;;  %s944_s13 = sphi %s1007_s13, %s1205_s13   ;;  %s940_s12 = sphi %s1005_s12, %s1204_s12  }
   0x5   : > { %s1030_s18 = sadd.s32 1, %s952_s15   ;;  %s92_s19 = sadd.s32 1, %s948_s14 }
   0x6   : > { %s89_s20 = ssub.s32 %s952_s15, %s1030_s18  ;;  %p102_p0 = scmp.ne.s32.totalorder %s948_s14, %s944_s13 }
   0x7   : > { %p90_p1 = scmp.eq.s32.totalorder %s89_s20, 0  ;;  %p103_p2 = scmp.eq.s32.totalorder %s1026_s16, 1 }
   0x8   : > { %p108_p3 = scmp.ne.s32.totalorder %s944_s13, %s940_s12  ;;  %p109_p4 = scmp.eq.s32.totalorder %s745_s17, 1 }
   0x9   : > { %s1041_s21 = scalar_select %p90_p1, %s948_s14, %s92_s19  }
   0xa   : > { %p1043_p5 = por %p103_p2, %p102_p0  ;;  %p1047_p6 = por %p109_p4, %p108_p3 }
   0xb   : > { %p746_p7 = scmp.ge.s32.totalorder %s952_s15, 1  ;;  %p116_p8 = scmp.lt.s32.totalorder %s952_s15, 3 }
   0xc   : > { %p787_p9 = scmp.eq.s32.totalorder %s1026_s16, 0  ;;  %s127_s26 = sshll.u32 %s1199_s1, 4  ;;  %s128_s26 = int_to_ptr.hbm [resolvable:$true] %s127_s26 }
   0xd   : > { %p117_p10 = pnand %p746_p7, %p116_p8  ;;  %s954_s27 = smov [#allocation4]  }
   0xe   : > { %s129_s28 = sshll.u32 %s954_s27, 4  ;;  %s955_s29 = smov 128   ;;  %s130_s28 = int_to_ptr.vmem [resolvable:$true] %s129_s28 }
   0xf   : > { %p779_p11 = pneg %p117_p10  ;;  %s956_s30 = smov 8  }
  0x10   : > { %156 = sbr.rel (%p117_p10) target bundleno = 549 (0x225), region = 32 }
  0x11   : > { %p780_p12 = pnand %p787_p9, %p779_p11 }
  0x13   : > { %782 = dma.hbm_to_vmem [thread:$0]  (!%p780_p12), %s128_s26, 256, %s130_s28, [#allocation5], %s955_s29, %s955_s29, %s956_s30  }
  0x15   : > { %931 = dma.done.wait (%p787_p9), [#allocation5], 256  }
  0x16   : > { %933 = vsyncadd (%p787_p9), [#allocation5], 4294967040  ;;  %p181_p13 = scmp.lt.s32.totalorder %s1026_s16, 1  ;;  %s957_s9 = smov 19   ;;  %vm187_vm0 = vcmask 568320   ;;  %v962_v6 = vmov 0.0  }
  0x17   : > { %s958_s10 = smov 23   ;;  %s959_s11 = smov 31   ;;  %186 = vst [vmem:[#allocation2] sm:$0xff] %v962_v6  ;;  %vm194_vm1 = vcmask 281752   ;;  %vm201_vm2 = vcmask 429352   ;;  %vm208_vm3 = vcmask 576952  }
  0x18   : > { %s182_s4 = scalar_select %p181_p13, %s1026_s16, 1  ;;  %188 = vst.msk [vmem:[#allocation2 + $0x8] sm:$0xf] %vm187_vm0, %v962_v6  ;;  %vm215_vm4 = vcmask 724552   ;;  %vm222_vm5 = vcmask 872152   ;;  %vm239_vm6 = vcmask 1044472  }
  0x19   : > { %s960_s17 = smov 21   ;;  %s961_s19 = smov 25   ;;  %vm240_vm7 = vcmask 121860   ;;  %vm236_vm8 = vcmask 252928   ;;  %vm229_vm9 = vcmask 1019752   ;;  %vm248_vm11 = vcmask 265352  }
  0x1a   : > { %s765_s5 = sshll.u32 %s182_s4, 3  ;;  %s963_s20 = smov 27   ;;  %vm241_vm10 = vmor %vm240_vm7, %vm239_vm6  ;;  %vm255_vm12 = vcmask 412952   ;;  %vm262_vm13 = vcmask 560552   ;;  %vm269_vm14 = vcmask 708152   ;;  %vm293_vm15 = vcmask 1044456  }
  0x1b   : > { %s1068_s8 = scalar_lea.vmem %s1198_s0, %s765_s5  ;;  %s964_s24 = smov 29   ;;  %vm294_vm0 = vcmask 105476   ;;  %vm309_vm6 = vcmask 396552   ;;  %vm326_vm7 = vcmask 257024  }
  0x1c   : > { %v189_v0 = vld [vmem:[%s1068_s8] sm:$0xf]  ;;  %s965_s25 = smov 33   ;;  %v250_v9 = vld [vmem:[%s1068_s8 + $0x4] sm:$0xf]  ;;  %s966_s26 = smov 35  }
  0x1d   : > { %v203_v1 = vld [vmem:[%s1068_s8] sm:$0xf]  ;;  %191 = vrot.lane.b32.xlu0 %v189_v0, %s957_s9  ;;  %v257_v10 = vld [vmem:[%s1068_s8 + $0x4] sm:$0xf]  ;;  %s967_s27 = smov 37   ;;  %s968_s28 = smov 39  }
  0x1e   : > { %205 = vrot.lane.b32.xlu1 %v203_v1, %s958_s10  ;;  %v231_v2 = vld [vmem:[%s1068_s8] sm:$0xf]  ;;  %v264_v11 = vld [vmem:[%s1068_s8 + $0x4] sm:$0xf]  ;;  %s969_s29 = smov 45   ;;  %s970_s30 = smov 41  }
  0x1f   : > { %233 = vrot.lane.b32.xlu2 %v231_v2, %s959_s11  ;;  %v196_v3 = vld [vmem:[%s1068_s8] sm:$0xf]  ;;  %v285_v12 = vld [vmem:[%s1068_s8 + $0x4] sm:$0xf]  ;;  %s971_s4 = smov 43   ;;  %s972_s5 = smov 47  }
  0x20   : > { %v210_v4 = vld [vmem:[%s1068_s8] sm:$0xf]  ;;  %v271_v13 = vld [vmem:[%s1068_s8 + $0x4] sm:$0xf]  ;;  %s973_s6 = smov 49   ;;  %s974_s7 = smov 127  }
  0x21   : > { %v217_v5 = vld [vmem:[%s1068_s8] sm:$0xf]  ;;  %v278_v14 = vld [vmem:[%s1068_s8 + $0x4] sm:$0xf]  ;;  %s976_s9 = smov 110   ;;  %s977_s10 = smov 109  }
  0x22   : > { %v224_v7 = vld [vmem:[%s1068_s8] sm:$0xf]  ;;  %v297_v15 = vld [vmem:[%s1068_s8 + $0x4] sm:$0xf]  ;;  %s978_s11 = smov 108  }
  0x23   : > { %v243_v8 = vld [vmem:[%s1068_s8] sm:$0xf]  ;;  %v304_v16 = vld [vmem:[%s1068_s8 + $0x4] sm:$0xf]  ;;  %s975_s8 = smov 126  }
  0x25   : > { %198 = vrot.lane.b32.xlu0 %v196_v3, %s960_s17  ;;  %s979_s17 = smov 92  }
  0x26   : > { %212 = vrot.lane.b32.xlu1 %v210_v4, %s961_s19  ;;  %s980_s19 = smov 91  }
  0x27   : > { %219 = vrot.lane.b32.xlu2 %v217_v5, %s963_s20  ;;  %s981_s20 = smov 90  }
  0x2d   : > { %226 = vrot.lane.b32.xlu0 %v224_v7, %s964_s24 }
  0x2e   : > { %245 = vrot.lane.b32.xlu1 %v243_v8, %s965_s25 }
  0x2f   : > { %252 = vrot.lane.b32.xlu2 %v250_v9, %s966_s26 }
  0x35   : > { %259 = vrot.lane.b32.xlu0 %v257_v10, %s967_s27 }
  0x36   : > { %266 = vrot.lane.b32.xlu1 %v264_v11, %s968_s28  ;;  %s178_s28 = sand.u32 1, %s944_s13  }
  0x37   : > { %287 = vrot.lane.b32.xlu2 %v285_v12, %s969_s29  ;;  %s771_s29 = smul.u32 48, %s178_s28 }
  0x3d   : > { %273 = vrot.lane.b32.xlu0 %v271_v13, %s970_s30  ;;  %s180_s30 = scalar_lea.vmem [#allocation7], %s771_s29 }
  0x3e   : > { %280 = vrot.lane.b32.xlu1 %v278_v14, %s971_s4  ;;  %s772_s4 = smul.u32 48, %s1026_s16  ;;  %s656_s16 = scalar_lea.sflag [#allocation6], %s178_s28 }
  0x3f   : > { %299 = vrot.lane.b32.xlu2 %v297_v15, %s972_s5 }
  0x45   : > { %306 = vrot.lane.b32.xlu0 %v304_v16, %s973_s6 }
  0x79   : > { %v234_v17 = vpop.permute.xlu2 %233 }
  0x7a   : > { %v235_v23 = vrot.slane %v234_v17, 4 }
  0x7c   : > { %v237_v27 = vsel %vm236_vm8, %v235_v23, %v234_v17  ;;  %vm353_vm8 = vcmask 261124  }
  0x81   : > { %v220_v20 = vpop.permute.xlu2 %219 }
  0x89   : > { %v253_v24 = vpop.permute.xlu2 %252 }
  0x8f   : > { %v192_v18 = vpop.permute.xlu0 %191 }
  0x90   : > { %v206_v19 = vpop.permute.xlu1 %205  ;;  %195 = vst.msk [vmem:[#allocation2] sm:$0xf] %vm194_vm1, %v192_v18  ;;  %vm276_vm1 = vcmask 855752  }
  0x91   : > { %v288_v30 = vpop.permute.xlu2 %287 }
  0x92   : > { %v289_v31 = vrot.slane %v288_v30, 4 }
  0x97   : > { %v199_v21 = vpop.permute.xlu0 %198 }
  0x98   : > { %v213_v22 = vpop.permute.xlu1 %212  ;;  %202 = vst.msk [vmem:[#allocation2] sm:$0xf] %vm201_vm2, %v199_v21  ;;  %vm290_vm2 = vcmask 367616  }
  0x99   : > { %209 = vst.msk [vmem:[#allocation2] sm:$0xf] %vm208_vm3, %v206_v19  ;;  %vm283_vm3 = vcmask 1003352   ;;  %v300_v34 = vpop.permute.xlu2 %299  ;;  %v291_v35 = vsel %vm290_vm2, %v289_v31, %v288_v30  ;;  %vm562_vm2 = vcmask 293888  }
  0x9a   : > { %216 = vst.msk [vmem:[#allocation2] sm:$0xf] %vm215_vm4, %v213_v22  ;;  %vm295_vm4 = vmor %vm294_vm0, %vm293_vm15  ;;  %vm524_vm15 = vcmask 736256   ;;  %vm345_vm0 = vcmask 1039360  }
  0x9b   : > { %223 = vst.msk [vmem:[#allocation2] sm:$0xf] %vm222_vm5, %v220_v20  ;;  %vm302_vm5 = vcmask 248952  }
  0x9f   : > { %v227_v25 = vpop.permute.xlu0 %226 }
  0xa0   : > { %v246_v26 = vpop.permute.xlu1 %245  ;;  %230 = vst.msk [vmem:[#allocation2] sm:$0xf] %vm229_vm9, %v227_v25  ;;  %vm371_vm9 = vcmask 1031168  }
  0xa1   : > { %242 = vst.msk [vmem:[#allocation2] sm:$0xff] %vm241_vm10, %v237_v27  ;;  %vm397_vm10 = vcmask 900096  }
  0xa2   : > { %249 = vst.msk [vmem:[#allocation2 + $0x4] sm:$0xf] %vm248_vm11, %v246_v26  ;;  %vm448_vm11 = vcmask 883712  }
  0xa3   : > { %256 = vst.msk [vmem:[#allocation2 + $0x4] sm:$0xf] %vm255_vm12, %v253_v24  ;;  %vm422_vm12 = vcmask 891904  }
  0xa7   : > { %v260_v28 = vpop.permute.xlu0 %259 }
  0xa8   : > { %v267_v29 = vpop.permute.xlu1 %266  ;;  %263 = vst.msk [vmem:[#allocation2 + $0x4] sm:$0xf] %vm262_vm13, %v260_v28  ;;  %vm473_vm13 = vcmask 752640  }
  0xa9   : > { %270 = vst.msk [vmem:[#allocation2 + $0x4] sm:$0xf] %vm269_vm14, %v267_v29  ;;  %vm499_vm14 = vcmask 744448  }
  0xaf   : > { %v274_v32 = vpop.permute.xlu0 %273 }
  0xb0   : > { %v281_v33 = vpop.permute.xlu1 %280  ;;  %277 = vst.msk [vmem:[#allocation2 + $0x4] sm:$0xf] %vm276_vm1, %v274_v32  ;;  %vm569_vm1 = vcmask 1043456  }
  0xb1   : > { %284 = vst.msk [vmem:[#allocation2 + $0x4] sm:$0xf] %vm283_vm3, %v281_v33  ;;  %vm650_vm3 = vcmask 261120  }
  0xb2   : > { %296 = vst.msk [vmem:[#allocation2 + $0x4] sm:$0xff] %vm295_vm4, %v291_v35 }
  0xb3   : > { %303 = vst.msk [vmem:[#allocation2 + $0x8] sm:$0xf] %vm302_vm5, %v300_v34 }
  0xb7   : > { %v307_v36 = vpop.permute.xlu0 %306 }
  0xb8   : > { %310 = vst.msk [vmem:[#allocation2 + $0x8] sm:$0xf] %vm309_vm6, %v307_v36 }
  0xb9   : > { %v1086_v37 = vld [vmem:[#allocation2] sm:$0xff] }
  0xba   : > { %315 = vst [vmem:[#allocation1] ss:$2 sm:$0xff] %v1086_v37 }
  0xbf   : > { %v312_v38 = vld [vmem:[#allocation2 + $0x8] sm:$0xf] }
  0xc0   : > { %317 = vst [vmem:[#allocation1 + $0x10] ss:$2 sm:$0xff] %v312_v38  ;;  %v329_v42 = vld [vmem:[#allocation2 + $0x8] sm:$0xf]  ;;  %v550_v38 = vld [vmem:[%s1200_s2] sm:$0xff] }
  0xc1   : > { %v318_v39 = vld.sshfl [vmem:[#allocation1] sm:$0xff pattern:$0x75316420]  ;;  %v319_v40 = vld.sshfl [vmem:[#allocation1 + $0x8] sm:$0xff pattern:$0x75316420] }
  0xc2   : > { %333 = vst [vmem:[#allocation1 + $0x1] ss:$2 sm:$0xff] %v1086_v37  ;;  %v356_v45 = vld [vmem:[#allocation2 + $0x8] sm:$0xf] }
  0xc3   : > { %324 = vst [vmem:[#allocation3] sm:$0xf] %v318_v39  ;;  %v381_v50 = vld [vmem:[#allocation2 + $0x8] sm:$0xf]  ;;  %v551_v39 = vld [vmem:[%s1200_s2 + $0x8] sm:$0xff] }
  0xc4   : > { %325 = vst [vmem:[#allocation3 + $0x8] sm:$0xf] %v319_v40  ;;  %v407_v54 = vld [vmem:[#allocation2 + $0x8] sm:$0xf] }
  0xc5   : > { %v432_v57 = vld [vmem:[#allocation2 + $0x8] sm:$0xf] }
  0xc6   : > { %v458_v61 = vld [vmem:[#allocation2 + $0x8] sm:$0xf] }
  0xc7   : > { %v320_v41 = vld.sshfl [vmem:[#allocation1 + $0x10] sm:$0xff pattern:$0x75316420] }
  0xc8   : > { %335 = vst [vmem:[#allocation1 + $0x11] ss:$2 sm:$0xff] %v329_v42  ;;  %v483_v1 = vld [vmem:[#allocation2 + $0x8] sm:$0xf]  ;;  %v982_v42 = vmov 0  }
  0xc9   : > { %327 = vst.msk [vmem:[#allocation3 + $0x10] sm:$0xf] %vm326_vm7, %v320_v41  ;;  %v1091_v43 = vld.sshfl [vmem:[#allocation1] sm:$0xff pattern:$0x75316420]  ;;  %853 = vset.pattern.permute.xlu1 %v982_v42  ;;  %854 = vset.pattern.permute.xlu2 %v982_v42 }
  0xca   : > { %v1093_v44 = vld.sshfl [vmem:[#allocation1 + $0x8] sm:$0xff pattern:$0x75316420]  ;;  %v509_v5 = vld [vmem:[#allocation2 + $0x8] sm:$0xf]  ;;  %855 = vset.pattern.permute.xlu0 %v982_v42 }
  0xcb   : > { %359 = vst [vmem:[#allocation1] ss:$2 sm:$0xff] %v1086_v37 }
  0xcf   : > { %v338_v46 = vld.sshfl [vmem:[#allocation1 + $0x10] sm:$0xff pattern:$0x75316420] }
  0xd0   : > { %343 = vrot.lane.b32.xlu0 %v338_v46, %s974_s7  ;;  %361 = vst [vmem:[#allocation1 + $0x10] ss:$2 sm:$0xff] %v356_v45 }
  0xd2   : > { %v363_v47 = vld.sshfl [vmem:[#allocation1 + $0x8] sm:$0xff pattern:$0x75316420]  ;;  %v1097_v48 = vld.sshfl [vmem:[#allocation1] sm:$0xff pattern:$0x75316420] }
  0xd3   : > { %367 = vrot.lane.b32.xlu2 %v363_v47, %s975_s8  ;;  %385 = vst [vmem:[#allocation1 + $0x1] ss:$2 sm:$0xff] %v1086_v37 }
  0xd7   : > { %v364_v49 = vld.sshfl [vmem:[#allocation1 + $0x10] sm:$0xff pattern:$0x75316420] }
  0xd8   : > { %369 = vrot.lane.b32.xlu1 %v364_v49, %s975_s8  ;;  %387 = vst [vmem:[#allocation1 + $0x11] ss:$2 sm:$0xff] %v381_v50 }
  0xda   : > { %v388_v51 = vld.sshfl [vmem:[#allocation1] sm:$0xff pattern:$0x75316420]  ;;  %v389_v52 = vld.sshfl [vmem:[#allocation1 + $0x8] sm:$0xff pattern:$0x75316420] }
  0xdb   : > { %393 = vrot.lane.b32.xlu0 %v389_v52, %s976_s9  ;;  %410 = vst [vmem:[#allocation1] ss:$2 sm:$0xff] %v1086_v37 }
  0xdf   : > { %v390_v53 = vld.sshfl [vmem:[#allocation1 + $0x10] sm:$0xff pattern:$0x75316420] }
  0xe0   : > { %395 = vrot.lane.b32.xlu2 %v390_v53, %s976_s9  ;;  %412 = vst [vmem:[#allocation1 + $0x10] ss:$2 sm:$0xff] %v407_v54 }
  0xe2   : > { %v413_v55 = vld.sshfl [vmem:[#allocation1] sm:$0xff pattern:$0x75316420]  ;;  %v414_v56 = vld.sshfl [vmem:[#allocation1 + $0x8] sm:$0xff pattern:$0x75316420] }
  0xe3   : > { %418 = vrot.lane.b32.xlu1 %v414_v56, %s977_s10  ;;  %436 = vst [vmem:[#allocation1 + $0x1] ss:$2 sm:$0xff] %v1086_v37 }
  0xe7   : > { %v415_v58 = vld.sshfl [vmem:[#allocation1 + $0x10] sm:$0xff pattern:$0x75316420] }
  0xe8   : > { %438 = vst [vmem:[#allocation1 + $0x11] ss:$2 sm:$0xff] %v432_v57 }
  0xea   : > { %v439_v59 = vld.sshfl [vmem:[#allocation1] sm:$0xff pattern:$0x75316420]  ;;  %v440_v60 = vld.sshfl [vmem:[#allocation1 + $0x8] sm:$0xff pattern:$0x75316420] }
  0xeb   : > { %444 = vrot.lane.b32.xlu2 %v440_v60, %s978_s11  ;;  %461 = vst [vmem:[#allocation1] ss:$2 sm:$0xff] %v1086_v37  ;;  %420 = vrot.lane.b32.xlu1 %v415_v58, %s977_s10  ;;  %v533_v58 = vld [vmem:[#allocation4] sm:$0xff] }
  0xef   : > { %v441_v62 = vld.sshfl [vmem:[#allocation1 + $0x10] sm:$0xff pattern:$0x75316420] }
  0xf0   : > { %463 = vst [vmem:[#allocation1 + $0x10] ss:$2 sm:$0xff] %v458_v61 }
  0xf2   : > { %v465_v63 = vld.sshfl [vmem:[#allocation1 + $0x8] sm:$0xff pattern:$0x75316420]  ;;  %v464_v0 = vld.sshfl [vmem:[#allocation1] sm:$0xff pattern:$0x75316420] }
  0xf3   : > { %469 = vrot.lane.b32.xlu0 %v465_v63, %s979_s17  ;;  %446 = vrot.lane.b32.xlu2 %v441_v62, %s978_s11  ;;  %487 = vst [vmem:[#allocation1 + $0x1] ss:$2 sm:$0xff] %v1086_v37 }
  0xf7   : > { %v466_v2 = vld.sshfl [vmem:[#allocation1 + $0x10] sm:$0xff pattern:$0x75316420] }
  0xf8   : > { %489 = vst [vmem:[#allocation1 + $0x11] ss:$2 sm:$0xff] %v483_v1 }
  0xfa   : > { %v491_v3 = vld.sshfl [vmem:[#allocation1 + $0x8] sm:$0xff pattern:$0x75316420]  ;;  %v490_v4 = vld.sshfl [vmem:[#allocation1] sm:$0xff pattern:$0x75316420] }
  0xfb   : > { %467 = vrot.lane.b32.xlu0 %v464_v0, %s979_s17  ;;  %495 = vrot.lane.b32.xlu1 %v491_v3, %s980_s19  ;;  %512 = vst [vmem:[#allocation1] ss:$2 sm:$0xff] %v1086_v37  ;;  %v534_v3 = vld [vmem:[#allocation4 + $0x8] sm:$0xff] }
  0xfc   : > { %471 = vrot.lane.b32.xlu2 %v466_v2, %s979_s17 }
  0xff   : > { %v492_v6 = vld.sshfl [vmem:[#allocation1 + $0x10] sm:$0xff pattern:$0x75316420] }
 0x100   : > { %514 = vst [vmem:[#allocation1 + $0x10] ss:$2 sm:$0xff] %v509_v5 }
 0x102   : > { %v515_v7 = vld.sshfl [vmem:[#allocation1] sm:$0xff pattern:$0x75316420]  ;;  %v516_v8 = vld.sshfl [vmem:[#allocation1 + $0x8] sm:$0xff pattern:$0x75316420] }
 0x103   : > { %493 = vrot.lane.b32.xlu1 %v490_v4, %s980_s19  ;;  %497 = vrot.lane.b32.xlu0 %v492_v6, %s980_s19 }
 0x104   : > { %518 = vrot.lane.b32.xlu2 %v515_v7, %s981_s20 }
 0x107   : > { %v517_v9 = vld.sshfl [vmem:[#allocation1 + $0x10] sm:$0xff pattern:$0x75316420] }
 0x10b   : > { %520 = vrot.lane.b32.xlu0 %v516_v8, %s981_s20  ;;  %522 = vrot.lane.b32.xlu1 %v517_v9, %s981_s20  ;;  %s906_s20 = scalar_lea.hbm %s1201_s3, 96 }
 0x10c   : > { %442 = vrot.lane.b32.xlu2 %v439_v59, %s978_s11 }
 0x113   : > { %341 = vrot.lane.b32.xlu0 %v1093_v44, %s974_s7  ;;  %416 = vrot.lane.b32.xlu1 %v413_v55, %s977_s10 }
 0x114   : > { %391 = vrot.lane.b32.xlu2 %v388_v51, %s976_s9 }
 0x11b   : > { %339 = vrot.lane.b32.xlu0 %v1091_v43, %s974_s7  ;;  %365 = vrot.lane.b32.xlu1 %v1097_v48, %s975_s8  ;;  %s667_s7 = scalar_lea.hbm %s1201_s3, %s772_s4  ;;  %s668_s8 = sshll.u32 %s180_s30, 4  ;;  %s669_s8 = int_to_ptr.vmem [resolvable:$true] %s668_s8 }
 0x11c   : > { %559 = vperm.xlu2 %854, %v551_v39   ;;  %s670_s9 = sshll.u32 %s667_s7, 4  ;;  %s671_s9 = int_to_ptr.hbm [resolvable:$true] %s670_s9 }
 0x11d   : > { %s900_s10 = sshra.s32 %s671_s9, 4  ;;  %s901_s10 = int_to_ptr.hbm [resolvable:$true] %s900_s10 }
 0x11e   : > { %s902_s11 = scalar_lea.hbm %s901_s10, 48  ;;  %p907_p3 = scmp.lt.s32.totalorder %s901_s10, %s1201_s3 }
 0x11f   : > { %p903_p0 = scmp.ne.s32.totalorder %s901_s10, %s902_s11  ;;  %p908_p4 = scmp.lt.s32.totalorder %s906_s20, %s902_s11 }
 0x121   : > { %p904_p1 = pnand %p903_p0, %p1043_p5  ;;  %p909_p7 = por %p908_p4, %p907_p3 }
 0x123   : > { %554 = vperm.xlu1 %853, %v550_v38   ;;  %p905_p2 = pneg %p904_p1 }
 0x125   : > { %p910_p8 = pnand %p909_p7, %p905_p2 }
 0x12d   : > { %v1122_v10 = vpop.permute.xlu2 %367 }
 0x13a   : > { %v396_v11 = vpop.permute.xlu2 %395 }
 0x13b   : > { %405 = vst.msk [vmem:[#allocation3 + $0x28] sm:$0xf0] %vm353_vm8, %v396_v11 }
 0x142   : > { %v1125_v12 = vpop.permute.xlu0 %343 }
 0x143   : > { %354 = vst.msk [vmem:[#allocation3 + $0x10] sm:$0xf0] %vm353_vm8, %v1125_v12 }
 0x145   : > { %v445_v13 = vpop.permute.xlu2 %444 }
 0x14a   : > { %v370_v14 = vpop.permute.xlu1 %369  ;;  %v537_v62 = vld [vmem:[#allocation3 + $0x10] sm:$0xff] }
 0x14b   : > { %v373_v15 = vsel %vm371_vm9, %v1122_v10, %v370_v14  ;;  %379 = vst.msk [vmem:[#allocation3 + $0x28] sm:$0xf] %vm326_vm7, %v370_v14 }
 0x14c   : > { %378 = vst [vmem:[#allocation3 + $0x20] sm:$0xf] %v373_v15 }
 0x14d   : > { %v394_v16 = vpop.permute.xlu0 %393  ;;  %v447_v17 = vpop.permute.xlu2 %446 }
 0x14e   : > { %v399_v18 = vsel %vm397_vm10, %v394_v16, %v396_v11  ;;  %v450_v19 = vsel %vm448_vm11, %v445_v13, %v447_v17  ;;  %456 = vst.msk [vmem:[#allocation3 + $0x40] sm:$0xf0] %vm353_vm8, %v447_v17 }
 0x14f   : > { %404 = vst [vmem:[#allocation3 + $0x20] sm:$0xf0] %v399_v18 }
 0x150   : > { %455 = vst [vmem:[#allocation3 + $0x38] sm:$0xf0] %v450_v19 }
 0x152   : > { %v540_v57 = vld [vmem:[#allocation3 + $0x28] sm:$0xff] }
 0x155   : > { %v419_v20 = vpop.permute.xlu1 %418 }
 0x156   : > { %v472_v21 = vpop.permute.xlu2 %471  ;;  %v539_v60 = vld [vmem:[#allocation3 + $0x20] sm:$0xff] }
 0x157   : > { %481 = vst.msk [vmem:[#allocation3 + $0x58] sm:$0xf] %vm326_vm7, %v472_v21 }
 0x15d   : > { %v421_v22 = vpop.permute.xlu1 %420 }
 0x15e   : > { %v424_v23 = vsel %vm422_vm12, %v419_v20, %v421_v22  ;;  %430 = vst.msk [vmem:[#allocation3 + $0x40] sm:$0xf] %vm326_vm7, %v421_v22  ;;  %v519_v24 = vpop.permute.xlu2 %518 }
 0x15f   : > { %429 = vst [vmem:[#allocation3 + $0x38] sm:$0xf] %v424_v23 }
 0x165   : > { %v470_v25 = vpop.permute.xlu0 %469  ;;  %v543_v55 = vld [vmem:[#allocation3 + $0x40] sm:$0xff] }
 0x166   : > { %v475_v26 = vsel %vm473_vm13, %v470_v25, %v472_v21  ;;  %v443_v27 = vpop.permute.xlu2 %442  ;;  %v542_v56 = vld [vmem:[#allocation3 + $0x38] sm:$0xff] }
 0x167   : > { %480 = vst [vmem:[#allocation3 + $0x50] sm:$0xf] %v475_v26  ;;  %v449_v28 = vsel %vm448_vm11, %v443_v27, %v445_v13 }
 0x168   : > { %454 = vst [vmem:[#allocation3 + $0x30] sm:$0xf0] %v449_v28 }
 0x16d   : > { %v468_v29 = vpop.permute.xlu0 %467  ;;  %v496_v30 = vpop.permute.xlu1 %495 }
 0x16e   : > { %v474_v31 = vsel %vm473_vm13, %v468_v29, %v470_v25  ;;  %v392_v32 = vpop.permute.xlu2 %391 }
 0x16f   : > { %479 = vst [vmem:[#allocation3 + $0x48] sm:$0xf] %v474_v31  ;;  %v398_v33 = vsel %vm397_vm10, %v392_v32, %v394_v16 }
 0x170   : > { %403 = vst [vmem:[#allocation3 + $0x18] sm:$0xf0] %v398_v33 }
 0x175   : > { %v494_v34 = vpop.permute.xlu1 %493  ;;  %v498_v35 = vpop.permute.xlu0 %497 }
 0x176   : > { %v500_v36 = vsel %vm499_vm14, %v494_v34, %v496_v30  ;;  %v501_v37 = vsel %vm499_vm14, %v496_v30, %v498_v35  ;;  %507 = vst.msk [vmem:[#allocation3 + $0x58] sm:$0xf0] %vm353_vm8, %v498_v35  ;;  %v560_v11 = vpop.permute.xlu2 %559 }
 0x177   : > { %505 = vst [vmem:[#allocation3 + $0x48] sm:$0xf0] %v500_v36 }
 0x178   : > { %506 = vst [vmem:[#allocation3 + $0x50] sm:$0xf0] %v501_v37 }
 0x17d   : > { %v521_v40 = vpop.permute.xlu0 %520  ;;  %v523_v41 = vpop.permute.xlu1 %522  ;;  %v546_v52 = vld [vmem:[#allocation3 + $0x58] sm:$0xff] }
 0x17e   : > { %v525_v43 = vsel %vm524_vm15, %v519_v24, %v521_v40  ;;  %v526_v44 = vsel %vm524_vm15, %v521_v40, %v523_v41  ;;  %532 = vst.msk [vmem:[#allocation3 + $0x70] sm:$0xf] %vm326_vm7, %v523_v41  ;;  %v544_v53 = vld [vmem:[#allocation3 + $0x48] sm:$0xff] }
 0x17f   : > { %530 = vst [vmem:[#allocation3 + $0x60] sm:$0xf] %v525_v43  ;;  %v545_v54 = vld [vmem:[#allocation3 + $0x50] sm:$0xff] }
 0x180   : > { %531 = vst [vmem:[#allocation3 + $0x68] sm:$0xf] %v526_v44 }
 0x185   : > { %v342_v45 = vpop.permute.xlu0 %341  ;;  %v417_v46 = vpop.permute.xlu1 %416  ;;  %v549_v47 = vld [vmem:[#allocation3 + $0x70] sm:$0xf] }
 0x186   : > { %v347_v48 = vsel %vm345_vm0, %v342_v45, %v1125_v12  ;;  %v423_v49 = vsel %vm422_vm12, %v417_v46, %v419_v20  ;;  %759 = vmatpush.msk.msra.mxu2 %vm569_vm1, %v549_v47  ;;  %v547_v50 = vld [vmem:[#allocation3 + $0x60] sm:$0xf] }
 0x187   : > { %352 = vst [vmem:[#allocation3 + $0x8] sm:$0xf0] %v347_v48  ;;  %753 = vmatpush.msk.msra.mxu0 %vm569_vm1, %v547_v50  ;;  %766 = vmatpush.msk.msra.mxu3 %vm569_vm1, %v547_v50  ;;  %v548_v51 = vld [vmem:[#allocation3 + $0x68] sm:$0xf] }
 0x188   : > { %428 = vst [vmem:[#allocation3 + $0x30] sm:$0xf] %v423_v49  ;;  %756 = vmatpush.msk.msra.mxu1 %vm569_vm1, %v548_v51  ;;  %637 = vmatpush.msra.mxu2 %v546_v52 }
 0x189   : > { %591 = vmatpush.msra.mxu0 %v544_v53  ;;  %767 = vmatpush.msra.mxu3 %v544_v53 }
 0x18a   : > { %614 = vmatpush.msra.mxu1 %v545_v54  ;;  %638 = vmatpush.msra.mxu2 %v543_v55 }
 0x18c   : > { %615 = vmatpush.msra.mxu1 %v542_v56  ;;  %639 = vmatpush.msra.mxu2 %v540_v57 }
 0x18d   : > { %v340_v59 = vpop.permute.xlu0 %339  ;;  %v366_v61 = vpop.permute.xlu1 %365 }
 0x18e   : > { %v346_v63 = vsel %vm345_vm0, %v340_v59, %v342_v45  ;;  %616 = vmatpush.msra.mxu1 %v539_v60  ;;  %v372_v0 = vsel %vm371_vm9, %v366_v61, %v1122_v10  ;;  %640 = vmatpush.msra.mxu2 %v537_v62  ;;  %v536_v1 = vld [vmem:[#allocation3 + $0x8] sm:$0xff] }
 0x18f   : > { %351 = vst [vmem:[#allocation3] sm:$0xf0] %v346_v63  ;;  %v541_v2 = vld [vmem:[#allocation3 + $0x30] sm:$0xff]  ;;  %760 = vmatmul.msk.f32.vlgmr.msra.gmra.mxu2 %vm562_vm2, %v533_v58 }
 0x190   : > { %377 = vst [vmem:[#allocation3 + $0x18] sm:$0xf] %v372_v0  ;;  %592 = vmatpush.msra.mxu0 %v541_v2  ;;  %768 = vmatpush.msra.mxu3 %v541_v2 }
 0x191   : > { %617 = vmatpush.msra.mxu1 %v536_v1 }
 0x192   : > { %757 = vmatmul.msk.f32.vlgmr.msra.gmra.mxu1 %vm562_vm2, %v533_v58 }
 0x195   : > { %v555_v6 = vpop.permute.xlu1 %554 }
 0x196   : > { %v535_v5 = vld [vmem:[#allocation3] sm:$0xff] }
 0x197   : > { %v538_v4 = vld [vmem:[#allocation3 + $0x18] sm:$0xff]  ;;  %761 = vmatmul.msk.f32.gmra.mxu2 %vm562_vm2, %v534_v3 }
 0x198   : > { %593 = vmatpush.msra.mxu0 %v538_v4  ;;  %769 = vmatpush.msra.mxu3 %v538_v4 }
 0x19a   : > { %594 = vmatpush.msra.mxu0 %v535_v5  ;;  %770 = vmatpush.msra.mxu3 %v535_v5 }
 0x19b   : > { %755 = vmatmul.msk.f32.vlgmr.msra.gmra.mxu3 %vm562_vm2, %v534_v3  ;;  %754 = vmatmul.msk.f32.vlgmr.msra.gmra.mxu0 %vm562_vm2, %v533_v58 }
 0x19c   : > { %758 = vmatmul.msk.f32.gmra.mxu1 %vm562_vm2, %v534_v3 }
 0x20f   : > { %v619_v7 = vpop.f32.mrf.mxu1 }
 0x210   : > { %v620_v8 = vadd.f32 %v619_v7, %v555_v6 }
 0x212   : > { %649 = vst [vmem:[%s180_s30 + $0x8] sm:$0xff] %v620_v8  ;;  %v642_v9 = vpop.f32.mrf.mxu2 }
 0x213   : > { %v643_v10 = vadd.f32 %v642_v9, %v555_v6 }
 0x215   : > { %651 = vst.msk [vmem:[%s180_s30 + $0x10] sm:$0xff] %vm650_vm3, %v643_v10 }
 0x218   : > { %v596_v12 = vpop.f32.mrf.mxu0 }
 0x219   : > { %v597_v13 = vadd.f32 %v596_v12, %v555_v6  ;;  %v622_v14 = vpop.f32.mrf.mxu1 }
 0x21a   : > { %v623_v15 = vadd.f32 %v622_v14, %v560_v11  ;;  %v645_v16 = vpop.f32.mrf.mxu2 }
 0x21b   : > { %648 = vst [vmem:[%s180_s30] sm:$0xff] %v597_v13  ;;  %v646_v17 = vadd.f32 %v645_v16, %v560_v11 }
 0x21c   : > { %653 = vst [vmem:[%s180_s30 + $0x20] sm:$0xff] %v623_v15 }
 0x21d   : > { %654 = vst.msk [vmem:[%s180_s30 + $0x28] sm:$0xff] %vm650_vm3, %v646_v17 }
 0x21e   : > { %v599_v18 = vpop.f32.mrf.mxu3 }
 0x21f   : > { %v600_v19 = vadd.f32 %v599_v18, %v560_v11 }
 0x221   : > { %652 = vst [vmem:[%s180_s30 + $0x18] sm:$0xff] %v600_v19 }
 0x222   : > { %913 = shalt.err (!%p910_p8)
}
 0x223   : > { %s983_s26 = smov 384   ;;  %s984_s27 = smov 24  }
 0x224   : > { %777 = dma.vmem_to_hbm [thread:$0]  (%p1043_p5), %s669_s8, 768, %s671_s9, %s656_s16, %s983_s26, %s983_s26, %s984_s27  }
 0x225 PF: > { %p789_p9 = scmp.ge.s32.totalorder %s952_s15, 2  ;;  %s685_s28 = sand.u32 1, %s940_s12  }
 0x226   : > { %s686_s29 = scalar_lea.sflag [#allocation6], %s685_s28 }
 0x227   : > { %p784_p10 = pnand %p789_p9, %p1047_p6 }
 0x229   : > { %p785_p11 = pneg %p784_p10 }
 0x22b   : > { %935 = dma.done.wait (%p785_p11), %s686_s29, 768  }
 0x22c   : > { %937 = vsyncadd (%p785_p11), %s686_s29, 4294966528  ;;  %p14_p12 = scmp.ge.s32.totalorder %s1030_s18, 4   ;;  %s1204_s12 = smov %s944_s13 }
 0x22d   : > { %s1205_s13 = smov %s948_s14  ;;  %s1206_s14 = smov %s1041_s21 }
 0x22e   : > { %s1207_s15 = smov %s1030_s18  ;;  %16 = sbr.rel (!%p14_p12) target bundleno = 4 (0x4), region = 85 }
 0x233   :  { %692 = vsyncpa [#allocation5], 1 }
 0x234   :  { %694 = vsyncpa [#allocation5 + $0x1], 1 }
 0x235   :  { %695 = vsyncpa [#allocation6], 1 }
 0x236   :  { %697 = vsyncpa [#allocation6 + $0x1], 1 }

</bundles_post_ra>
